<compile_context>
chip_gen: v6e
topology: v6e:2x2x1
jax: 0.10.0
libtpu: 0.0.40
codegen_flags: <defaults>
</compile_context>

<pallas_src>
import jax
import jax.numpy as jnp
from jax.experimental import pallas as pl
from jax.experimental.pallas import tpu as pltpu


def _mlp_kernel(x_ref, w1_ref, b1_ref, w2_ref, b2_ref, o_ref):
    x = x_ref[...]                                                   # (bt, n_in)
    h = jnp.dot(x, w1_ref[...], preferred_element_type=jnp.float32)  # (bt, h_pad)  MXU
    h = jnp.maximum(h + b1_ref[...], 0.0)                            # bias + ReLU on VPU (f32)
    y = jnp.dot(h.astype(w2_ref.dtype), w2_ref[...],
                preferred_element_type=jnp.float32)                  # (bt, o_pad)  MXU
    o_ref[...] = (y + b2_ref[...]).astype(o_ref.dtype)               # full 128-lane store


def _round_up(n, m):
    return ((n + m - 1) // m) * m


def nn_forward(x, w1, b1, w2, b2, *, block_batch=128):
    """Pallas equivalent of NN.forward: Linear(n_in, n_hidden) -> ReLU -> Linear(n_hidden, n_out).

    w1: (n_in, n_hidden)   (PyTorch weight transposed)
    b1: (1, n_hidden)
    w2: (n_hidden, n_out)  (PyTorch weight transposed)
    b2: (1, n_out)
    """
    batch, n_in = x.shape
    n_hidden = w1.shape[1]
    n_out = w2.shape[1]

    # Pad feature dims to full 128-lane vregs; pad batch to a multiple of the batch tile.
    h_pad = _round_up(n_hidden, 128)          # 300 -> 384
    o_pad = _round_up(max(n_out, 1), 128)     # 2   -> 128 (lane-dense output store)
    bt = min(block_batch, _round_up(batch, 8))
    b_pad = _round_up(batch, bt)

    xp = jnp.pad(x, ((0, b_pad - batch), (0, 0)))
    w1p = jnp.pad(w1, ((0, 0), (0, h_pad - n_hidden)))
    b1p = jnp.pad(b1, ((0, 0), (0, h_pad - n_hidden)))
    w2p = jnp.pad(w2, ((0, h_pad - n_hidden), (0, o_pad - n_out)))
    b2p = jnp.pad(b2, ((0, 0), (0, o_pad - n_out)))

    out = pl.pallas_call(
        _mlp_kernel,
        out_shape=jax.ShapeDtypeStruct((b_pad, o_pad), x.dtype),
        grid_spec=pl.GridSpec(
            grid=(b_pad // bt,),
            in_specs=[
                pl.BlockSpec((bt, n_in), lambda i: (i, 0)),       # x streams per batch tile
                pl.BlockSpec((n_in, h_pad), lambda i: (0, 0)),    # weights/biases stay resident
                pl.BlockSpec((1, h_pad), lambda i: (0, 0)),
                pl.BlockSpec((h_pad, o_pad), lambda i: (0, 0)),
                pl.BlockSpec((1, o_pad), lambda i: (0, 0)),
            ],
            out_specs=pl.BlockSpec((bt, o_pad), lambda i: (i, 0)),
        ),
        compiler_params=pltpu.CompilerParams(
            dimension_semantics=("parallel",)),
    )(xp, w1p, b1p, w2p, b2p)

    return out[:batch, :n_out]


if __name__ == "__main__":
    # Shapes consistent with the module: NN(n_inputs=32, n_outputs=2, n_hidden=300)
    batch, n_inputs, n_hidden, n_outputs = 8, 32, 300, 2

    key = jax.random.PRNGKey(0)
    kx, k1, k2, k3, k4 = jax.random.split(key, 5)

    x = jax.random.normal(kx, (batch, n_inputs), dtype=jnp.float32)

    # Deterministic PyTorch-Linear-like uniform init, stored pre-transposed.
    lim1 = 1.0 / jnp.sqrt(jnp.float32(n_inputs))
    lim2 = 1.0 / jnp.sqrt(jnp.float32(n_hidden))
    w1 = jax.random.uniform(k1, (n_inputs, n_hidden), jnp.float32, -lim1, lim1)
    b1 = jax.random.uniform(k2, (1, n_hidden), jnp.float32, -lim1, lim1)
    w2 = jax.random.uniform(k3, (n_hidden, n_outputs), jnp.float32, -lim2, lim2)
    b2 = jax.random.uniform(k4, (1, n_outputs), jnp.float32, -lim2, lim2)

    out = nn_forward(x, w1, b1, w2, b2)
    out = jax.block_until_ready(out)

    # Pure-JAX reference of the same forward semantics.
    ref = jnp.maximum(x @ w1 + b1, 0.0) @ w2 + b2
    assert out.shape == (batch, n_outputs)
    assert jnp.allclose(out, ref, atol=1e-5, rtol=1e-5)

    print("KERNEL_OK")
</pallas_src>

<mosaic_0001>
module attributes {stable_mosaic.version = 11 : i64} {
  func.func @_mlp_kernel(%arg0: i32, %arg1: memref<8x32xf32, #tpu.memory_space<vmem>>, %arg2: memref<32x384xf32, #tpu.memory_space<vmem>>, %arg3: memref<1x384xf32, #tpu.memory_space<vmem>>, %arg4: memref<384x128xf32, #tpu.memory_space<vmem>>, %arg5: memref<1x128xf32, #tpu.memory_space<vmem>>, %arg6: memref<8x128xf32, #tpu.memory_space<vmem>>) attributes {dimension_semantics = [#tpu.dimension_semantics<parallel>], iteration_bounds = array<i64: 1>, scalar_prefetch = 0 : i64, scratch_operands = 0 : i64, tpu.core_type = #tpu.core_type<tc>, window_params = [{transform_indices = @transform_0, window_bounds = array<i64: 8, 32>}, {pipeline_mode = #tpu.pipeline_mode<synchronous>, transform_indices = @transform_1, window_bounds = array<i64: 32, 384>}, {pipeline_mode = #tpu.pipeline_mode<synchronous>, transform_indices = @transform_2, window_bounds = array<i64: 1, 384>}, {pipeline_mode = #tpu.pipeline_mode<synchronous>, transform_indices = @transform_3, window_bounds = array<i64: 384, 128>}, {pipeline_mode = #tpu.pipeline_mode<synchronous>, transform_indices = @transform_4, window_bounds = array<i64: 1, 128>}, {transform_indices = @transform_5, window_bounds = array<i64: 8, 128>}]} {
    %c0 = arith.constant 0 : index
    %c0_0 = arith.constant 0 : index
    %0 = vector.load %arg1[%c0, %c0_0] : memref<8x32xf32, #tpu.memory_space<vmem>>, vector<8x32xf32>
    %c0_1 = arith.constant 0 : index
    %c0_2 = arith.constant 0 : index
    %1 = vector.load %arg2[%c0_1, %c0_2] : memref<32x384xf32, #tpu.memory_space<vmem>>, vector<32x384xf32>
    %cst = arith.constant dense<0.000000e+00> : vector<8x384xf32>
    %2 = tpu.matmul %0, %1, %cst {dimension_numbers = #tpu.dot_dimension_numbers<[1], [0], [0], [1], [0, 0, 1, 1], [], []>} : vector<8x32xf32>, vector<32x384xf32>, vector<8x384xf32> -> vector<8x384xf32>
    %c0_3 = arith.constant 0 : index
    %c0_4 = arith.constant 0 : index
    %3 = vector.load %arg3[%c0_3, %c0_4] : memref<1x384xf32, #tpu.memory_space<vmem>>, vector<1x384xf32>
    %4 = vector.broadcast %3 : vector<1x384xf32> to vector<8x384xf32>
    %5 = arith.addf %2, %4 : vector<8x384xf32>
    %cst_5 = arith.constant 0.000000e+00 : f32
    %6 = vector.broadcast %cst_5 : f32 to vector<8x384xf32>
    %7 = arith.maximumf %5, %6 : vector<8x384xf32>
    %c0_6 = arith.constant 0 : index
    %c0_7 = arith.constant 0 : index
    %8 = vector.load %arg4[%c0_6, %c0_7] : memref<384x128xf32, #tpu.memory_space<vmem>>, vector<384x128xf32>
    %cst_8 = arith.constant dense<0.000000e+00> : vector<8x128xf32>
    %9 = tpu.matmul %7, %8, %cst_8 {dimension_numbers = #tpu.dot_dimension_numbers<[1], [0], [0], [1], [0, 0, 1, 1], [], []>} : vector<8x384xf32>, vector<384x128xf32>, vector<8x128xf32> -> vector<8x128xf32>
    %c0_9 = arith.constant 0 : index
    %c0_10 = arith.constant 0 : index
    %10 = vector.load %arg5[%c0_9, %c0_10] : memref<1x128xf32, #tpu.memory_space<vmem>>, vector<1x128xf32>
    %11 = vector.broadcast %10 : vector<1x128xf32> to vector<8x128xf32>
    %12 = arith.addf %9, %11 : vector<8x128xf32>
    %c0_11 = arith.constant 0 : index
    %c0_12 = arith.constant 0 : index
    %13 = vector.load %arg6[%c0_11, %c0_12] : memref<8x128xf32, #tpu.memory_space<vmem>>, vector<8x128xf32>
    tpu.vector_store %arg6[%c0_11, %c0_12], %12 {strides = array<i32>} : memref<8x128xf32, #tpu.memory_space<vmem>>, vector<8x128xf32>,
    return
  }
  func.func @transform_0(%arg0: i32) -> (i32, i32) {
    %c0_i32 = arith.constant 0 : i32
    %c0_i32_0 = arith.constant 0 : i32
    return %arg0, %c0_i32 : i32, i32
  }
  func.func @transform_1(%arg0: i32) -> (i32, i32) {
    %c0_i32 = arith.constant 0 : i32
    %c0_i32_0 = arith.constant 0 : i32
    %c0_i32_1 = arith.constant 0 : i32
    return %c0_i32, %c0_i32_0 : i32, i32
  }
  func.func @transform_2(%arg0: i32) -> (i32, i32) {
    %c0_i32 = arith.constant 0 : i32
    %c0_i32_0 = arith.constant 0 : i32
    %c0_i32_1 = arith.constant 0 : i32
    return %c0_i32, %c0_i32_0 : i32, i32
  }
  func.func @transform_3(%arg0: i32) -> (i32, i32) {
    %c0_i32 = arith.constant 0 : i32
    %c0_i32_0 = arith.constant 0 : i32
    %c0_i32_1 = arith.constant 0 : i32
    return %c0_i32, %c0_i32_0 : i32, i32
  }
  func.func @transform_4(%arg0: i32) -> (i32, i32) {
    %c0_i32 = arith.constant 0 : i32
    %c0_i32_0 = arith.constant 0 : i32
    %c0_i32_1 = arith.constant 0 : i32
    return %c0_i32, %c0_i32_0 : i32, i32
  }
  func.func @transform_5(%arg0: i32) -> (i32, i32) {
    %c0_i32 = arith.constant 0 : i32
    %c0_i32_0 = arith.constant 0 : i32
    return %arg0, %c0_i32 : i32, i32
  }
}

</mosaic_0001>

<bundles_post_ra>
// kernel: tpu_custom_call.1
= control target key start
LH: loop header
LB: loop body
LE: loop exit
PB: predicated region body
PF: predicated region fallthrough
CT: control target
= control target key end

     0   :  { %10 = vsyncpa [#allocation3], 0  ;;  %s737_s0 = inlined_call_operand.hbm [shape: f32[8,32], index: 0, kind: input, shape index: {}]   ;;  %s738_s1 = inlined_call_operand.hbm [shape: f32[32,384], index: 1, kind: input, shape index: {}]   ;;  %s739_s2 = inlined_call_operand.vmem [shape: f32[1,384], index: 2, kind: input, shape index: {}]   ;;  %s740_s3 = inlined_call_operand.hbm [shape: f32[384,128], index: 3, kind: input, shape index: {}]   ;;  %s741_s4 = inlined_call_operand.vmem [shape: f32[1,128], index: 4, kind: input, shape index: {}]   ;;  %s742_s5 = inlined_call_operand.hbm [shape: f32[8,128], index: 5, kind: output, shape index: {}]  }
   0x1   :  { %11 = vsyncpa [#allocation6], 0 }
   0x2   :  { %12 = vsyncpa [#allocation4], 0  ;;  %s652_s18 = smov [#allocation5]  }
   0x3   :  { %s28_s19 = sshll.u32 %s652_s18, 4  ;;  %s29_s19 = int_to_ptr.vmem [resolvable:$true] %s28_s19 }
   0x4   :  { %s574_s20 = scalar_lea.vmem %s29_s19, 1536  ;;  %p579_p1 = scmp.lt.s32.totalorder %s29_s19, %s29_s19 }
   0x5   :  { %p575_p0 = scmp.ne.s32.totalorder %s29_s19, %s574_s20  ;;  %p580_p2 = scmp.lt.s32.totalorder %s574_s20, %s574_s20 }
   0x7   :  { %p581_p3 = por %p580_p2, %p579_p1 }
   0x9   :  { %p582_p4 = pnand %p581_p3, %p575_p0 }
   0xb   :  { %585 = shalt.err (!%p582_p4)
}
   0xc   :  { %s653_s21 = smov 384   ;;  %s654_s22 = smov 24  }
   0xd   :  { %34 = dma.hbm_to_vmem [thread:$0]  %s738_s1, 1536, %s29_s19, [#allocation6], %s653_s21, %s653_s21, %s654_s22  }
   0xe   :  { %s655_s25 = smov [#allocation2]   ;;  %s656_s27 = smov [#allocation7]  }
   0xf   :  { %s19_s26 = sshll.u32 %s655_s25, 4  ;;  %s42_s28 = sshll.u32 %s656_s27, 4  ;;  %s20_s26 = int_to_ptr.vmem [resolvable:$true] %s19_s26  ;;  %s43_s28 = int_to_ptr.vmem [resolvable:$true] %s42_s28 }
  0x10   :  { %s594_s29 = scalar_lea.vmem %s20_s26, 128  ;;  %p599_p6 = scmp.lt.s32.totalorder %s20_s26, %s20_s26 }
  0x11   :  { %p595_p5 = scmp.ne.s32.totalorder %s20_s26, %s594_s29  ;;  %p600_p7 = scmp.lt.s32.totalorder %s594_s29, %s594_s29 }
  0x13   :  { %p601_p8 = por %p600_p7, %p599_p6 }
  0x15   :  { %p602_p9 = pnand %p601_p8, %p595_p5 }
  0x17   :  { %605 = shalt.err (!%p602_p9)
}
  0x18   :  { %22 = dma.hbm_to_vmem [thread:$0]  %s737_s0, 128, %s20_s26, [#allocation3]  }
  0x19   :  { %s614_s7 = scalar_lea.vmem %s43_s28, 6144  ;;  %p619_p11 = scmp.lt.s32.totalorder %s43_s28, %s43_s28 }
  0x1a   :  { %p615_p10 = scmp.ne.s32.totalorder %s43_s28, %s614_s7  ;;  %p620_p12 = scmp.lt.s32.totalorder %s614_s7, %s614_s7 }
  0x1c   :  { %p621_p13 = por %p620_p12, %p619_p11 }
  0x1e   :  { %p622_p0 = pnand %p621_p13, %p615_p10 }
  0x20   :  { %625 = shalt.err (!%p622_p0)
}
  0x21   :  { %s657_s1 = smov 128   ;;  %s658_s8 = smov 8  }
  0x22   :  { %48 = dma.hbm_to_vmem [thread:$0]  %s740_s3, 6144, %s43_s28, [#allocation6], %s657_s1, %s657_s1, %s658_s8  }
  0x23   :  { %646 = dma.done.wait [#allocation3], 128  }
  0x24   :  { %647 = vsyncadd [#allocation3], 4294967168 }
  0x25   :  { %648 = dma.done.wait [#allocation6], 7680  }
  0x26   :  { %649 = vsyncadd [#allocation6], 4294959616  ;;  %v659_v0 = vmov 0.0   ;;  %vm660_vm0 = vmmov 0   ;;  %v71_v1 = vld [vmem:[#allocation5 + $0x50] sm:$0xff]  ;;  %v70_v2 = vld [vmem:[#allocation5 + $0x48] sm:$0xff]  ;;  %v75_v62 = vlaneseq }
  0x27   :  { %158 = vmatprep.mubr.f32.mxu0 %v659_v0  ;;  %510 = vmatprep.subr.mxu1 %v659_v0  ;;  %v68_v3 = vld [vmem:[#allocation5 + $0x38] sm:$0xff]  ;;  %v67_v4 = vld [vmem:[#allocation5 + $0x30] sm:$0xff]  ;;  %v65_v5 = vld [vmem:[#allocation5 + $0x20] sm:$0xff]  ;;  %vm90_vm1 = vcmask 261120   ;;  %s661_s12 = smov [#allocation8]  }
  0x28   :  { %518 = vmatprep.mubr.msk.f32.mxu1 %vm660_vm0, %v659_v0  ;;  %118 = vmatprep.subr.mxu0 %v71_v1  ;;  %v64_v6 = vld [vmem:[#allocation5 + $0x18] sm:$0xff]  ;;  %v69_v8 = vld [vmem:[#allocation5 + $0x40] sm:$0xff]  ;;  %v62_v9 = vld [vmem:[#allocation5 + $0x8] sm:$0xff]  ;;  %v76_v63 = vshrl.u32 %v75_v62, 7  ;;  %s440_s13 = sshll.u32 %s661_s12, 4  ;;  %s441_s13 = int_to_ptr.vmem [resolvable:$true] %s440_s13 }
  0x29   :  { %119 = vmatpush1.msra.mxu0 %v70_v2  ;;  %v72_v7 = vld [vmem:[#allocation5 + $0x58] sm:$0xff]  ;;  %v61_v10 = vld [vmem:[#allocation5] sm:$0xff]  ;;  %v66_v11 = vld [vmem:[#allocation5 + $0x28] sm:$0xff]  ;;  %s626_s14 = scalar_lea.vmem %s441_s13, 128  ;;  %p631_p2 = scmp.lt.s32.totalorder %s441_s13, %s441_s13 }
  0x2a   :  { %120 = vmatprep.subr.mxu0 %v68_v3  ;;  %511 = vmatpush3.msra.mxu1 %v72_v7  ;;  %v60_v12 = vld [vmem:[#allocation2] sm:$0xff]  ;;  %v63_v13 = vld [vmem:[#allocation5 + $0x10] sm:$0xff]  ;;  %v267_v19 = vld [vmem:[#allocation7 + $0xe8] sm:$0xff]  ;;  %v77_v1 = vsub.s32 0, %v76_v63  ;;  %v81_v3 = vsub.s32 1, %v76_v63  ;;  %p627_p1 = scmp.ne.s32.totalorder %s441_s13, %s626_s14  ;;  %p632_p3 = scmp.lt.s32.totalorder %s626_s14, %s626_s14 }
  0x2b   :  { %121 = vmatpush1.msra.mxu0 %v67_v4  ;;  %512 = vmatprep.subr.mxu1 %v659_v0  ;;  %v269_v14 = vld [vmem:[#allocation7 + $0xf8] sm:$0xff]  ;;  %v268_v16 = vld [vmem:[#allocation7 + $0xf0] sm:$0xff]  ;;  %v251_v20 = vld [vmem:[#allocation7 + $0x68] sm:$0xff]  ;;  %v85_v4 = vsub.s32 2, %v76_v63 }
  0x2c   :  { %122 = vmatprep.subr.mxu0 %v65_v5  ;;  %513 = vmatpush3.msra.mxu1 %v69_v8  ;;  %v253_v15 = vld [vmem:[#allocation7 + $0x78] sm:$0xff]  ;;  %v252_v17 = vld [vmem:[#allocation7 + $0x70] sm:$0xff]  ;;  %v266_v22 = vld [vmem:[#allocation7 + $0xe0] sm:$0xff]  ;;  %p633_p4 = por %p632_p3, %p631_p2 }
  0x2d   :  { %123 = vmatpush1.msra.mxu0 %v64_v6  ;;  %514 = vmatprep.subr.mxu1 %v659_v0  ;;  %v285_v18 = vld [vmem:[#allocation7 + $0x178] sm:$0xff]  ;;  %v284_v21 = vld [vmem:[#allocation7 + $0x170] sm:$0xff]  ;;  %v250_v23 = vld [vmem:[#allocation7 + $0x60] sm:$0xff] }
  0x2e   :  { %124 = vmatprep.subr.mxu0 %v62_v9  ;;  %515 = vmatpush3.msra.mxu1 %v66_v11  ;;  %v283_v24 = vld [vmem:[#allocation7 + $0x168] sm:$0xff]  ;;  %v265_v25 = vld [vmem:[#allocation7 + $0xd8] sm:$0xff]  ;;  %v282_v27 = vld [vmem:[#allocation7 + $0x160] sm:$0xff]  ;;  %p634_p5 = pnand %p633_p4, %p627_p1 }
  0x2f   :  { %125 = vmatpush1.msra.mxu0 %v61_v10  ;;  %516 = vmatprep.subr.mxu1 %v659_v0  ;;  %v249_v26 = vld [vmem:[#allocation7 + $0x58] sm:$0xff]  ;;  %v264_v28 = vld [vmem:[#allocation7 + $0xd0] sm:$0xff]  ;;  %v263_v31 = vld [vmem:[#allocation7 + $0xc8] sm:$0xff] }
  0x30   :  { %450 = vmatmul.mubr.msk.f32.vlgmr.msra.gmra.mxu0 %vm90_vm1, %v60_v12  ;;  %517 = vmatpush3.msra.mxu1 %v63_v13  ;;  %v248_v29 = vld [vmem:[#allocation7 + $0x50] sm:$0xff]  ;;  %v281_v30 = vld [vmem:[#allocation7 + $0x158] sm:$0xff]  ;;  %v247_v32 = vld [vmem:[#allocation7 + $0x48] sm:$0xff] }
  0x31   :  { %458 = vmatprep.subr.mxu0 %v269_v14  ;;  %519 = vmatmul.mubr.msk.f32.vlgmr.msra.gmra.mxu1 %vm90_vm1, %v60_v12  ;;  %v280_v33 = vld [vmem:[#allocation7 + $0x150] sm:$0xff]  ;;  %v262_v34 = vld [vmem:[#allocation7 + $0xc0] sm:$0xff]  ;;  %v279_v36 = vld [vmem:[#allocation7 + $0x148] sm:$0xff] }
  0x32   :  { %459 = vmatpush3.msra.mxu0 %v253_v15  ;;  %521 = vmatprep.subr.mxu1 %v659_v0  ;;  %v246_v35 = vld [vmem:[#allocation7 + $0x40] sm:$0xff]  ;;  %v261_v37 = vld [vmem:[#allocation7 + $0xb8] sm:$0xff]  ;;  %v260_v40 = vld [vmem:[#allocation7 + $0xb0] sm:$0xff] }
  0x33   :  { %460 = vmatprep.subr.mxu0 %v268_v16  ;;  %522 = vmatpush3.msra.mxu1 %v285_v18  ;;  %v245_v38 = vld [vmem:[#allocation7 + $0x38] sm:$0xff]  ;;  %v278_v39 = vld [vmem:[#allocation7 + $0x140] sm:$0xff]  ;;  %v244_v41 = vld [vmem:[#allocation7 + $0x30] sm:$0xff] }
  0x34   :  { %461 = vmatpush3.msra.mxu0 %v252_v17  ;;  %523 = vmatprep.subr.mxu1 %v659_v0  ;;  %v277_v42 = vld [vmem:[#allocation7 + $0x138] sm:$0xff]  ;;  %v259_v43 = vld [vmem:[#allocation7 + $0xa8] sm:$0xff]  ;;  %v276_v45 = vld [vmem:[#allocation7 + $0x130] sm:$0xff] }
  0x35   :  { %462 = vmatprep.subr.mxu0 %v267_v19  ;;  %524 = vmatpush3.msra.mxu1 %v284_v21  ;;  %v243_v44 = vld [vmem:[#allocation7 + $0x28] sm:$0xff]  ;;  %v258_v46 = vld [vmem:[#allocation7 + $0xa0] sm:$0xff]  ;;  %v257_v48 = vld [vmem:[#allocation7 + $0x98] sm:$0xff] }
  0x36   :  { %463 = vmatpush3.msra.mxu0 %v251_v20  ;;  %525 = vmatprep.subr.mxu1 %v659_v0  ;;  %v242_v47 = vld [vmem:[#allocation7 + $0x20] sm:$0xff]  ;;  %v241_v49 = vld [vmem:[#allocation7 + $0x18] sm:$0xff]  ;;  %v275_v50 = vld [vmem:[#allocation7 + $0x128] sm:$0xff] }
  0x37   :  { %464 = vmatprep.subr.mxu0 %v266_v22  ;;  %526 = vmatpush3.msra.mxu1 %v283_v24  ;;  %v256_v51 = vld [vmem:[#allocation7 + $0x90] sm:$0xff]  ;;  %v274_v53 = vld [vmem:[#allocation7 + $0x120] sm:$0xff]  ;;  %v255_v54 = vld [vmem:[#allocation7 + $0x88] sm:$0xff] }
  0x38   :  { %465 = vmatpush3.msra.mxu0 %v250_v23  ;;  %527 = vmatprep.subr.mxu1 %v659_v0  ;;  %v240_v52 = vld [vmem:[#allocation7 + $0x10] sm:$0xff]  ;;  %v239_v55 = vld [vmem:[#allocation7 + $0x8] sm:$0xff]  ;;  %v273_v56 = vld [vmem:[#allocation7 + $0x118] sm:$0xff] }
  0x39   :  { %466 = vmatprep.subr.mxu0 %v265_v25  ;;  %528 = vmatpush3.msra.mxu1 %v282_v27  ;;  %v254_v57 = vld [vmem:[#allocation7 + $0x80] sm:$0xff]  ;;  %v272_v59 = vld [vmem:[#allocation7 + $0x110] sm:$0xff]  ;;  %v271_v60 = vld [vmem:[#allocation7 + $0x108] sm:$0xff] }
  0x3a   :  { %467 = vmatpush3.msra.mxu0 %v249_v26  ;;  %529 = vmatprep.subr.mxu1 %v659_v0  ;;  %v238_v58 = vld [vmem:[#allocation7] sm:$0xff]  ;;  %v73_v2 = vld [vmem:[%s739_s2] sm:$0x7] }
  0x3b   :  { %468 = vmatprep.subr.mxu0 %v264_v28  ;;  %530 = vmatpush3.msra.mxu1 %v281_v30  ;;  %v270_v61 = vld [vmem:[#allocation7 + $0x100] sm:$0xff]  ;;  %v78_v5 = vrot.slane %v73_v2, %v77_v1  ;;  %v82_v6 = vrot.slane %v73_v2, %v81_v3  ;;  %v86_v7 = vrot.slane %v73_v2, %v85_v4  ;;  %v452_v21 = vld [vmem:[%s741_s4] ss:$0 sm:$0xff] }
  0x3c   :  { %469 = vmatpush3.msra.mxu0 %v248_v29  ;;  %531 = vmatprep.subr.mxu1 %v659_v0 }
  0x3d   :  { %470 = vmatprep.subr.mxu0 %v263_v31  ;;  %532 = vmatpush3.msra.mxu1 %v280_v33 }
  0x3e   :  { %471 = vmatpush3.msra.mxu0 %v247_v32  ;;  %533 = vmatprep.subr.mxu1 %v659_v0 }
  0x3f   :  { %472 = vmatprep.subr.mxu0 %v262_v34  ;;  %534 = vmatpush3.msra.mxu1 %v279_v36 }
  0x40   :  { %473 = vmatpush3.msra.mxu0 %v246_v35  ;;  %535 = vmatprep.subr.mxu1 %v659_v0 }
  0x41   :  { %474 = vmatprep.subr.mxu0 %v261_v37  ;;  %536 = vmatpush3.msra.mxu1 %v278_v39 }
  0x42   :  { %475 = vmatpush3.msra.mxu0 %v245_v38  ;;  %537 = vmatprep.subr.mxu1 %v659_v0 }
  0x43   :  { %476 = vmatprep.subr.mxu0 %v260_v40  ;;  %538 = vmatpush3.msra.mxu1 %v277_v42 }
  0x44   :  { %477 = vmatpush3.msra.mxu0 %v244_v41  ;;  %539 = vmatprep.subr.mxu1 %v659_v0 }
  0x45   :  { %478 = vmatprep.subr.mxu0 %v259_v43  ;;  %540 = vmatpush3.msra.mxu1 %v276_v45 }
  0x46   :  { %479 = vmatpush3.msra.mxu0 %v243_v44  ;;  %541 = vmatprep.subr.mxu1 %v659_v0 }
  0x47   :  { %480 = vmatprep.subr.mxu0 %v258_v46  ;;  %553 = vmatprep.mubr.msk.f32.mxu1 %vm660_vm0, %v659_v0 }
  0x48   :  { %481 = vmatpush3.msra.mxu0 %v242_v47  ;;  %542 = vmatpush3.msra.mxu1 %v275_v50 }
  0x49   :  { %482 = vmatprep.subr.mxu0 %v257_v48  ;;  %543 = vmatprep.subr.mxu1 %v659_v0 }
  0x4a   :  { %483 = vmatpush3.msra.mxu0 %v241_v49  ;;  %544 = vmatpush3.msra.mxu1 %v274_v53 }
  0x4b   :  { %484 = vmatprep.subr.mxu0 %v256_v51  ;;  %545 = vmatprep.subr.mxu1 %v659_v0 }
  0x4c   :  { %485 = vmatpush3.msra.mxu0 %v240_v52  ;;  %546 = vmatpush3.msra.mxu1 %v273_v56 }
  0x4d   :  { %486 = vmatprep.subr.mxu0 %v255_v54  ;;  %547 = vmatprep.subr.mxu1 %v659_v0 }
  0x4e   :  { %487 = vmatpush3.msra.mxu0 %v239_v55  ;;  %548 = vmatpush3.msra.mxu1 %v272_v59 }
  0x4f   :  { %488 = vmatprep.subr.mxu0 %v254_v57  ;;  %549 = vmatprep.subr.mxu1 %v659_v0 }
  0x50   :  { %489 = vmatpush3.msra.mxu0 %v238_v58  ;;  %550 = vmatpush3.msra.mxu1 %v271_v60 }
  0x51   :  { %551 = vmatprep.subr.mxu1 %v659_v0 }
  0x52   :  { %552 = vmatpush3.msra.mxu1 %v270_v61 }
  0xf0   :  { %v160_v8 = vpop.f32.mrf.mxu0 }
  0xf1   :  { %v161_v9 = vadd.f32 %v160_v8, %v78_v5  ;;  %v231_v11 = vpop.f32.mrf.mxu1 }
  0xf2   :  { %v162_v10 = vpop.f32.mrf.mxu0  ;;  %v232_v13 = vadd.f32 %v231_v11, %v86_v7 }
  0xf3   :  { %v163_v12 = vadd.f32 %v162_v10, %v82_v6  ;;  %v520_v0 = vpop.f32.mrf.mxu1  ;;  %v235_v16 = vmax.f32 %v161_v9, 0.0 }
  0xf4   :  { %v237_v15 = vmax.f32 %v232_v13, 0.0 }
  0xf5   :  { %v236_v14 = vmax.f32 %v163_v12, 0.0 }
  0xf6   :  { %554 = vmatmul.mubr.f32.vlgmr.msra.gmra.mxu1 %v237_v15 }
  0xf7   :  { %357 = vmatprep.mubr.f32.mxu0 %v236_v14 }
  0xf8   :  { %358 = vmatmul.mubr.f32.vlgmr.msra.gmra.mxu0 %v235_v16 }
 0x1b6   :  { %v429_v17 = vpop.f32.mrf.mxu1 }
 0x1b8   :  { %v490_v18 = vpop.f32.mrf.mxu0  ;;  %v555_v19 = vpop.f32.mrf.mxu1 }
 0x1ba   :  { %v491_v20 = vpop.f32.mrf.mxu0 }
 0x1bb   :  { %v492_v22 = vadd.f32 %v491_v20, %v490_v18 }
 0x1bd   :  { %v360_v23 = vadd.f32 %v492_v22, %v452_v21 }
 0x1bf   :  { %v430_v24 = vadd.f32 %v429_v17, %v360_v23 }
 0x1c1   :  { %433 = vst [vmem:[#allocation8] sm:$0xff] %v430_v24 }
 0x1c2   :  { %637 = shalt.err (!%p634_p5)
}
 0x1c3   :  { %443 = dma.vmem_to_hbm [thread:$0]  %s441_s13, 128, %s742_s5, [#allocation4]  }
 0x1c4   :  { %650 = dma.done.wait [#allocation4], 128  }
 0x1c5   :  { %651 = vsyncadd [#allocation4], 4294967168 }
 0x1c6   :  { %447 = vsyncpa [#allocation3], 1 }
 0x1c7   :  { %448 = vsyncpa [#allocation6], 1 }
 0x1c8   :  { %449 = vsyncpa [#allocation4], 1 }

</bundles_post_ra>
